<compile_context>
chip_gen: v5e
topology: v5e:2x2
jax: 0.10.0
libtpu: 0.0.40
codegen_flags: <defaults>
</compile_context>

<pallas_src>
import jax
import jax.numpy as jnp
from jax.experimental import pallas as pl
from jax.experimental.pallas import tpu as pltpu


# ----------------------------- Pallas kernels ------------------------------

def _make_fused_tcn_kernel(dilations, has_downsample, T, compute_dtype):
    """Fused TCN blocks + composite head; one row tile (whole batch segments)
    per grid step.  Refs: (x, t_rows, *params, out)."""
    f32 = jnp.float32

    def mm(a, w_ref):
        # MXU matmul: operands in compute_dtype, accumulate in f32.
        return jnp.dot(a.astype(compute_dtype), w_ref[...],
                       preferred_element_type=f32)

    def kernel(*refs):
        x_ref, t_ref = refs[0], refs[1]          # (rows, Cin), (rows, 1)
        o_ref = refs[-1]                         # (rows, 1)
        prefs = list(refs[2:-1])

        rows = x_ref.shape[0]
        # Hoisted iota: time index of each row within its length-T segment.
        row_t = jax.lax.broadcasted_iota(jnp.int32, (rows, 1), 0) % T

        h = x_ref[...].astype(f32)               # elementwise math stays f32
        idx = 0
        for blk, d in enumerate(dilations):
            w1_ref, b1_ref, w2_ref, b2_ref = prefs[idx:idx + 4]
            idx += 4
            if has_downsample[blk]:
                wd_ref, bd_ref = prefs[idx:idx + 2]
                idx += 2
            else:
                wd_ref = bd_ref = None

            # Segment-causal mask for this dilation; shared by both convs.
            mask_d = row_t >= d                  # (rows, 1) bool

            def causal_conv(a, w_ref, b_ref, d=d, mask_d=mask_d):
                # y[b, t] = W_k0 @ a[b, t-d] + W_k1 @ a[b, t]   (a[b, t-d]=0 if t<d)
                prev = pltpu.roll(a, d, 0)                  # XLU sublane roll
                prev = jnp.where(mask_d, prev, 0.0)         # zero rows with t < d
                a_cat = jnp.concatenate([prev, a], axis=1)  # (rows, 2*Cin)
                return mm(a_cat, w_ref) + b_ref[...]

            h1 = jnp.maximum(causal_conv(h, w1_ref, b1_ref), 0.0)   # relu1 (dropout=id)
            h2 = jnp.maximum(causal_conv(h1, w2_ref, b2_ref), 0.0)  # relu2 (dropout=id)
            if wd_ref is None:
                res = h                                     # identity residual: no matmul
            else:
                res = mm(h, wd_ref) + bd_ref[...]           # 1x1 downsample conv
            h = jnp.maximum(h2 + res, 0.0)

        # composite MLP head (per timestep)
        cw1_ref, cb1_ref, cw2_ref, cb2_ref, cw3r_ref, cb3_ref = prefs[idx:idx + 6]
        c = jnp.maximum(mm(h, cw1_ref) + cb1_ref[...], 0.0)
        c = jnp.maximum(mm(c, cw2_ref) + cb2_ref[...], 0.0)
        # (H2 -> 1) projection as a lane reduction (avoids a 1-lane MXU matmul).
        c = jnp.sum(c * cw3r_ref[...], axis=-1, keepdims=True) + cb3_ref[...]
        # fused epilogue: add the time-broadcast static head and store.
        # TODO(synk): output is (rows, 1) -> masked 1-lane stores; a lane-dense
        # (tiles, rows) slab would avoid them, but the (rows,1)->(tb,T) in-kernel
        # reshape is a layout crossing and the output traffic here is negligible
        # relative to the MXU work, so keep the proven store path.
        o_ref[...] = c + t_ref[...]

    return kernel


def _make_static_head_kernel(compute_dtype):
    """s_composite MLP: (B, num_static) -> (B, 1).  Tiny, single invocation."""
    f32 = jnp.float32

    def mm(a, w_ref):
        return jnp.dot(a.astype(compute_dtype), w_ref[...],
                       preferred_element_type=f32)

    def kernel(s_ref, w1_ref, b1_ref, w2_ref, b2_ref, w3_ref, b3_ref, o_ref):
        t = jnp.maximum(mm(s_ref[...], w1_ref) + b1_ref[...], 0.0)
        t = jnp.maximum(mm(t, w2_ref) + b2_ref[...], 0.0)
        o_ref[...] = mm(t, w3_ref) + b3_ref[...]

    return kernel


# ------------------------------ JAX wrapper ---------------------------------

def _choose_tile_batches(B, T, target_rows=2048):
    """Batches per row tile: whole length-T segments, layout-aligned blocks.
    Tile sized for ~2K rows so double-buffered tiles stay far below the
    scoped-VMEM defaults on v5e/v6e and v7x's 64 MiB."""
    if B * T <= target_rows:
        return B                      # single tile: block == full array dims
    best = B                          # fallback: single tile
    for tb in range(1, B):
        # %16 keeps the sublane dim legal for both f32 (8) and bf16 (16) tiles.
        if B % tb == 0 and tb * T <= target_rows and (tb * T) % 16 == 0:
            best = tb                 # keep the largest qualifying tb
    return best


def _flatten_main_params(params, compute_dtype):
    """Fused / cast parameter list for the main kernel (+ downsample flags)."""
    f32 = jnp.float32
    flat, has_ds = [], []
    for blk in params["blocks"]:
        # fuse the two conv taps along the contraction axis: [W_k0; W_k1]
        w1 = jnp.concatenate([blk["w1_k0"], blk["w1_k1"]], axis=0).astype(compute_dtype)
        w2 = jnp.concatenate([blk["w2_k0"], blk["w2_k1"]], axis=0).astype(compute_dtype)
        flat += [w1, blk["b1"].astype(f32), w2, blk["b2"].astype(f32)]
        if "wd" in blk:
            flat += [blk["wd"].astype(compute_dtype), blk["bd"].astype(f32)]
            has_ds.append(True)
        else:
            has_ds.append(False)
    hp = params["head"]
    flat += [hp["cw1"].astype(compute_dtype), hp["cb1"].astype(f32),
             hp["cw2"].astype(compute_dtype), hp["cb2"].astype(f32),
             jnp.transpose(hp["cw3"]).astype(f32),   # (1, H2) row for lane reduce
             hp["cb3"].astype(f32)]
    return flat, has_ds


def temporal_conv_static_l(x, s, params, dilations, *,
                           compute_dtype=jnp.float32, target_tile_rows=2048):
    """x: (B, C_in, T) (PyTorch NCW), s: (B, num_static) -> (B, T, 1) float32."""
    f32 = jnp.float32
    B, c_in, T = x.shape
    N = B * T
    hp = params["head"]

    # ---- static MLP head: (B, num_static) -> (B, 1), one tiny kernel ----
    static_args = [s.astype(f32),
                   hp["sw1"].astype(compute_dtype), hp["sb1"].astype(f32),
                   hp["sw2"].astype(compute_dtype), hp["sb2"].astype(f32),
                   hp["sw3"].astype(compute_dtype), hp["sb3"].astype(f32)]
    t = pl.pallas_call(
        _make_static_head_kernel(compute_dtype),
        out_shape=jax.ShapeDtypeStruct((B, 1), f32),
        in_specs=[pl.BlockSpec(memory_space=pltpu.MemorySpace.VMEM)] * len(static_args),
        out_specs=pl.BlockSpec(memory_space=pltpu.MemorySpace.VMEM),
    )(*static_args)
    # broadcast over time: flattened row r belongs to batch r // T.
    t_rows = jnp.repeat(t, T, axis=0)                        # (N, 1) f32

    # ---- fused TCN blocks + composite head, gridded over row tiles ----
    h0 = jnp.transpose(x, (0, 2, 1)).reshape(N, c_in).astype(compute_dtype)
    flat, has_ds = _flatten_main_params(params, compute_dtype)

    tb = _choose_tile_batches(B, T, target_tile_rows)
    rows = tb * T
    grid = (B // tb,)

    in_specs = [pl.BlockSpec((rows, c_in), lambda i: (i, 0)),   # activation row tile
                pl.BlockSpec((rows, 1), lambda i: (i, 0))]      # static-head add tile
    # weights/biases: full-array blocks, constant index_map -> resident in VMEM
    # (block index never changes, so they are DMA'd once, not per grid step).
    in_specs += [pl.BlockSpec(p.shape, lambda i: (0, 0)) for p in flat]
    out_specs = pl.BlockSpec((rows, 1), lambda i: (i, 0))

    out = pl.pallas_call(
        _make_fused_tcn_kernel(tuple(dilations), tuple(has_ds), T, compute_dtype),
        out_shape=jax.ShapeDtypeStruct((N, 1), f32),
        grid=grid,
        in_specs=in_specs,
        out_specs=out_specs,
        compiler_params=pltpu.CompilerParams(
            dimension_semantics=("parallel",)),   # shard row tiles across TCs (v7x)
    )(h0, t_rows, *flat)
    return out.reshape(B, T, 1)


# ----------------------- deterministic parameter init -----------------------

def init_params(key, num_inputs, num_channels, num_static, c_param, sc_param):
    keys = jax.random.split(key, 64)
    kit = iter(keys)

    def w(shape, scale=0.1):
        return scale * jax.random.normal(next(kit), shape, jnp.float32)

    blocks = []
    in_c = num_inputs
    for out_c in num_channels:
        # Conv1d weight (Cout, Cin, K=2) stored as two taps transposed to (Cin, Cout).
        blk = dict(
            w1_k0=w((in_c, out_c)), w1_k1=w((in_c, out_c)), b1=w((1, out_c), 0.05),
            w2_k0=w((out_c, out_c)), w2_k1=w((out_c, out_c)), b2=w((1, out_c), 0.05),
        )
        if in_c != out_c:                       # downsample only when shapes differ
            blk["wd"] = w((in_c, out_c))
            blk["bd"] = w((1, out_c), 0.05)
        blocks.append(blk)
        in_c = out_c

    c_in = num_channels[-1]
    head = dict(
        cw1=w((c_in, c_param[0])),         cb1=w((1, c_param[0]), 0.05),
        cw2=w((c_param[0], c_param[1])),   cb2=w((1, c_param[1]), 0.05),
        cw3=w((c_param[-2], 1)),           cb3=w((1, 1), 0.05),
        sw1=w((num_static, sc_param[0])),  sb1=w((1, sc_param[0]), 0.05),
        sw2=w((sc_param[0], sc_param[1])), sb2=w((1, sc_param[1]), 0.05),
        sw3=w((sc_param[-2], 1)),          sb3=w((1, 1), 0.05),
    )
    return dict(blocks=blocks, head=head)


# --------------------------- pure-JAX reference ------------------------------

def reference(x, s, params, dilations):
    B, _, T = x.shape
    h = jnp.transpose(x, (0, 2, 1))                        # (B, T, Cin)
    for blk, d in zip(params["blocks"], dilations):
        def causal(inp, w0, w1, b, d=d):
            prev = jnp.pad(inp, ((0, 0), (d, 0), (0, 0)))[:, :T, :]
            return inp @ w1 + prev @ w0 + b
        h1 = jax.nn.relu(causal(h, blk["w1_k0"], blk["w1_k1"], blk["b1"]))
        h2 = jax.nn.relu(causal(h1, blk["w2_k0"], blk["w2_k1"], blk["b2"]))
        res = (h @ blk["wd"] + blk["bd"]) if "wd" in blk else h
        h = jax.nn.relu(h2 + res)
    hp = params["head"]
    c = jax.nn.relu(h @ hp["cw1"] + hp["cb1"])
    c = jax.nn.relu(c @ hp["cw2"] + hp["cb2"])
    c = c @ hp["cw3"] + hp["cb3"]                          # (B, T, 1)
    t = jax.nn.relu(s @ hp["sw1"] + hp["sb1"])
    t = jax.nn.relu(t @ hp["sw2"] + hp["sb2"])
    t = t @ hp["sw3"] + hp["sb3"]                          # (B, 1)
    return c + t[:, None, :]


# ---------------------------------- main -------------------------------------

if __name__ == "__main__":
    # Small shapes consistent with the module (channels/hidden shrunk to 32).
    B, T = 2, 16
    num_inputs = 4
    num_channels = [32, 32, 32, 32]
    num_static = 8
    c_param = [32, 32, 0.2]
    sc_param = [32, 32, 32, 0.2]
    dilations = [2 ** i for i in range(len(num_channels))]   # [1, 2, 4, 8]

    key = jax.random.PRNGKey(0)
    kx, ks, kp = jax.random.split(key, 3)
    x = jax.random.normal(kx, (B, num_inputs, T), jnp.float32)   # PyTorch NCW
    s = jax.random.normal(ks, (B, num_static), jnp.float32)
    params = init_params(kp, num_inputs, num_channels, num_static, c_param, sc_param)

    ref = reference(x, s, params, dilations)

    # f32 path: exact module semantics, tight tolerance.
    out = jax.block_until_ready(
        temporal_conv_static_l(x, s, params, dilations, compute_dtype=jnp.float32))
    assert out.shape == (B, T, 1)
    assert jnp.allclose(out, ref, atol=1e-4, rtol=1e-4)

    # bf16 matmul operands (f32 accumulate / elementwise): perf mode for v6e/v7x.
    out_bf16 = jax.block_until_ready(
        temporal_conv_static_l(x, s, params, dilations, compute_dtype=jnp.bfloat16))
    assert out_bf16.shape == (B, T, 1)
    assert jnp.allclose(out_bf16, ref, atol=3e-2, rtol=3e-2)

    print("KERNEL_OK")
</pallas_src>

<mosaic_0001>
module attributes {stable_mosaic.version = 11 : i64} {
  func.func @kernel(%arg0: memref<2x8xf32, #tpu.memory_space<vmem>>, %arg1: memref<8x32xf32, #tpu.memory_space<vmem>>, %arg2: memref<1x32xf32, #tpu.memory_space<vmem>>, %arg3: memref<32x32xf32, #tpu.memory_space<vmem>>, %arg4: memref<1x32xf32, #tpu.memory_space<vmem>>, %arg5: memref<32x1xf32, #tpu.memory_space<vmem>>, %arg6: memref<1x1xf32, #tpu.memory_space<vmem>>, %arg7: memref<2x1xf32, #tpu.memory_space<vmem>>) attributes {dimension_semantics = [], scalar_prefetch = 0 : i64, scratch_operands = 0 : i64, tpu.core_type = #tpu.core_type<tc>} {
    %c0 = arith.constant 0 : index
    %c0_0 = arith.constant 0 : index
    %0 = vector.load %arg0[%c0, %c0_0] : memref<2x8xf32, #tpu.memory_space<vmem>>, vector<2x8xf32>
    %c0_1 = arith.constant 0 : index
    %c0_2 = arith.constant 0 : index
    %1 = vector.load %arg1[%c0_1, %c0_2] : memref<8x32xf32, #tpu.memory_space<vmem>>, vector<8x32xf32>
    %cst = arith.constant dense<0.000000e+00> : vector<2x32xf32>
    %2 = tpu.matmul %0, %1, %cst {dimension_numbers = #tpu.dot_dimension_numbers<[1], [0], [0], [1], [0, 0, 1, 1], [], []>} : vector<2x8xf32>, vector<8x32xf32>, vector<2x32xf32> -> vector<2x32xf32>
    %c0_3 = arith.constant 0 : index
    %c0_4 = arith.constant 0 : index
    %3 = vector.load %arg2[%c0_3, %c0_4] : memref<1x32xf32, #tpu.memory_space<vmem>>, vector<1x32xf32>
    %4 = vector.broadcast %3 : vector<1x32xf32> to vector<2x32xf32>
    %5 = arith.addf %2, %4 : vector<2x32xf32>
    %cst_5 = arith.constant 0.000000e+00 : f32
    %6 = vector.broadcast %cst_5 : f32 to vector<2x32xf32>
    %7 = arith.maximumf %5, %6 : vector<2x32xf32>
    %c0_6 = arith.constant 0 : index
    %c0_7 = arith.constant 0 : index
    %8 = vector.load %arg3[%c0_6, %c0_7] : memref<32x32xf32, #tpu.memory_space<vmem>>, vector<32x32xf32>
    %cst_8 = arith.constant dense<0.000000e+00> : vector<2x32xf32>
    %9 = tpu.matmul %7, %8, %cst_8 {dimension_numbers = #tpu.dot_dimension_numbers<[1], [0], [0], [1], [0, 0, 1, 1], [], []>} : vector<2x32xf32>, vector<32x32xf32>, vector<2x32xf32> -> vector<2x32xf32>
    %c0_9 = arith.constant 0 : index
    %c0_10 = arith.constant 0 : index
    %10 = vector.load %arg4[%c0_9, %c0_10] : memref<1x32xf32, #tpu.memory_space<vmem>>, vector<1x32xf32>
    %11 = vector.broadcast %10 : vector<1x32xf32> to vector<2x32xf32>
    %12 = arith.addf %9, %11 : vector<2x32xf32>
    %cst_11 = arith.constant 0.000000e+00 : f32
    %13 = vector.broadcast %cst_11 : f32 to vector<2x32xf32>
    %14 = arith.maximumf %12, %13 : vector<2x32xf32>
    %c0_12 = arith.constant 0 : index
    %c0_13 = arith.constant 0 : index
    %15 = vector.load %arg5[%c0_12, %c0_13] : memref<32x1xf32, #tpu.memory_space<vmem>>, vector<32x1xf32>
    %cst_14 = arith.constant dense<0.000000e+00> : vector<2x1xf32>
    %16 = tpu.matmul %14, %15, %cst_14 {dimension_numbers = #tpu.dot_dimension_numbers<[1], [0], [0], [1], [0, 0, 1, 1], [], []>} : vector<2x32xf32>, vector<32x1xf32>, vector<2x1xf32> -> vector<2x1xf32>
    %c0_15 = arith.constant 0 : index
    %c0_16 = arith.constant 0 : index
    %17 = vector.load %arg6[%c0_15, %c0_16] : memref<1x1xf32, #tpu.memory_space<vmem>>, vector<1x1xf32>
    %18 = vector.broadcast %17 : vector<1x1xf32> to vector<2x1xf32>
    %19 = arith.addf %16, %18 : vector<2x1xf32>
    %c0_17 = arith.constant 0 : index
    %c0_18 = arith.constant 0 : index
    %20 = vector.load %arg7[%c0_17, %c0_18] : memref<2x1xf32, #tpu.memory_space<vmem>>, vector<2x1xf32>
    tpu.vector_store %arg7[%c0_17, %c0_18], %19 {strides = array<i32>} : memref<2x1xf32, #tpu.memory_space<vmem>>, vector<2x1xf32>,
    return
  }
}

</mosaic_0001>

<bundles_post_ra>
// kernel: tpu_custom_call.1
= control target key start
LH: loop header
LB: loop body
LE: loop exit
PB: predicated region body
PF: predicated region fallthrough
CT: control target
= control target key end

     0   :  { %s260_s0 = inlined_call_operand.vmem [shape: f32[2,8], index: 0, kind: input, shape index: {}]   ;;  %s261_s1 = inlined_call_operand.hbm [shape: f32[8,32], index: 1, kind: input, shape index: {}]   ;;  %s262_s2 = inlined_call_operand.vmem [shape: f32[1,32], index: 2, kind: input, shape index: {}]   ;;  %s263_s3 = inlined_call_operand.vmem [shape: f32[32,32], index: 3, kind: input, shape index: {}]   ;;  %s264_s4 = inlined_call_operand.vmem [shape: f32[1,32], index: 4, kind: input, shape index: {}]   ;;  %s265_s5 = inlined_call_operand.vmem [shape: f32[32,1], index: 5, kind: input, shape index: {}]   ;;  %s266_s6 = inlined_call_operand.<no memory space> [shape: f32[1,1], index: 6, kind: input, shape index: {}]   ;;  %s267_s7 = inlined_call_operand.vmem [shape: f32[2,1], index: 7, kind: output, shape index: {}]  }
   0x1   :  { %v12_v0 = vstv %s266_s6 }
   0x2   :  { %13 = vst [vmem:[#allocation2] sm:$0x1] %v12_v0 }
   0x3   :  { %14 = vsyncpa [#allocation4], 0  ;;  %s22_s28 = sshll.u32 %s261_s1, 4  ;;  %s177_s29 = smov [#allocation3]   ;;  %s23_s28 = int_to_ptr.hbm [resolvable:$true] %s22_s28 }
   0x4   :  { %s24_s30 = sshll.u32 %s177_s29, 4  ;;  %s25_s30 = int_to_ptr.vmem [resolvable:$true] %s24_s30 }
   0x5   :  { %27 = dma.hbm_to_vmem [thread:$0]  %s23_s28, 128, %s25_s30, [#allocation4]  }
   0x6   :  { %175 = dma.done.wait [#allocation4], 128  }
   0x7   :  { %176 = vsyncadd [#allocation4], 4294967168  ;;  %vm48_vm0 = vcmask 64512   ;;  %v43_v1 = vld [vmem:[#allocation3] sm:$0xff]  ;;  %v76_v3 = vld [vmem:[%s263_s3 + $0x18] sm:$0xff]  ;;  %vm81_vm1 = vcmask 261120  }
   0x8   :  { %v42_v2 = vld [vmem:[%s260_s0] sm:$0x3]  ;;  %67 = vmatpush.msra.mxu0 %v43_v1  ;;  %97 = vmatpush.msra.mxu1 %v76_v3  ;;  %v75_v4 = vld [vmem:[%s263_s3 + $0x10] sm:$0xff]  ;;  %v74_v5 = vld [vmem:[%s263_s3 + $0x8] sm:$0xff]  ;;  %vm137_vm2 = vcmask 1024  }
   0x9   :  { %144 = vmatmul.msk.f32.vlgmr.msra.gmra.mxu0 %vm48_vm0, %v42_v2  ;;  %v73_v6 = vld [vmem:[%s263_s3] sm:$0xff]  ;;  %v109_v7 = vld [vmem:[%s265_s5 + $0x18] sm:$0xff]  ;;  %v108_v12 = vld [vmem:[%s265_s5 + $0x10] sm:$0xff] }
   0xa   :  { %98 = vmatpush.msra.mxu1 %v75_v4  ;;  %129 = vmatpush.msra.mxu2 %v109_v7  ;;  %v148_v8 = vld [vmem:[%s262_s2] ss:$0 sm:$0xff]  ;;  %v107_v13 = vld [vmem:[%s265_s5 + $0x8] sm:$0xff] }
   0xb   :  { %v106_v14 = vld [vmem:[%s265_s5] sm:$0xff] }
   0xc   :  { %99 = vmatpush.msra.mxu1 %v74_v5  ;;  %130 = vmatpush.msra.mxu2 %v108_v12  ;;  %v149_v15 = vld [vmem:[%s264_s4] ss:$0 sm:$0xff] }
   0xd   :  { %v150_v19 = vld [vmem:[#allocation2] ss:$0 sm:$0xff] }
   0xe   :  { %100 = vmatpush.msra.mxu1 %v73_v6  ;;  %131 = vmatpush.msra.mxu2 %v107_v13 }
  0x10   :  { %132 = vmatpush.msra.mxu2 %v106_v14 }
  0x86   :  { %v69_v9 = vpop.f32.mrf.mxu0 }
  0x87   :  { %v70_v10 = vadd.f32 %v148_v8, %v69_v9 }
  0x89   :  { %v72_v11 = vmax.f32 %v70_v10, 0.0 }
  0x8b   :  { %145 = vmatmul.msk.f32.vlgmr.msra.gmra.mxu1 %vm81_vm1, %v72_v11 }
 0x108   :  { %v102_v16 = vpop.f32.mrf.mxu1 }
 0x109   :  { %v103_v17 = vadd.f32 %v149_v15, %v102_v16 }
 0x10b   :  { %v105_v18 = vmax.f32 %v103_v17, 0.0 }
 0x10d   :  { %146 = vmatmul.msk.f32.vlgmr.msra.gmra.mxu2 %vm81_vm1, %v105_v18 }
 0x190   :  { %v134_v20 = vpop.f32.mrf.mxu2 }
 0x191   :  { %v135_v21 = vadd.f32 %v150_v19, %v134_v20 }
 0x193   :  { %138 = vst.msk [vmem:[%s267_s7] sm:$0x3] %vm137_vm2, %v135_v21 }
 0x194   :  { %143 = vsyncpa [#allocation4], 1 }

</bundles_post_ra>
